<compile_context>
chip_gen: v5e
topology: v5e:2x2
jax: 0.10.0
libtpu: 0.0.40
codegen_flags: <defaults>
</compile_context>

<pallas_src>
import jax
import jax.numpy as jnp
from jax.experimental import pallas as pl
from jax.experimental.pallas import tpu as pltpu

EPS = 1e-10


def _l2norm_kernel(x_ref, o_ref):
    # x_ref block: (TB, D). Full feature axis resident -> dim=1 reduction is
    # local to this block.
    x = x_ref[...]
    xf = x.astype(jnp.float32)
    sq_sum = jnp.sum(xf * xf, axis=1, keepdims=True)      # (TB, 1) f32
    inv_norm = jax.lax.rsqrt(sq_sum + EPS)                 # EUP rsqrt
    # Multiply in f32, cast once to the output dtype.
    o_ref[...] = (xf * inv_norm).astype(o_ref.dtype)


def _vmem_budget():
    """(target bytes per pipeline buffer, physical VMEM capacity)."""
    try:
        cap = int(pltpu.get_tpu_info().vmem_capacity_bytes)
    except Exception:
        cap = 128 << 20
    if cap <= (64 << 20):
        # v7x-class: fast HBM, 64 MiB VMEM -> big tiles to amortize per-step
        # overhead (~0.35 us/step).
        return 8 << 20, cap
    # v5e / v6e: 128 MiB physical VMEM; 4 MiB/buffer is at the roofline knee.
    return 4 << 20, cap


def _choose_block_b(B: int, D: int, itemsize: int,
                    target_bytes_per_buf: int, align: int) -> int:
    """Bandwidth-friendly, sublane-aligned row tile."""
    row_bytes = max(1, D * itemsize)
    rows = max(align, (target_bytes_per_buf // row_bytes) // align * align)
    # Keep >= 2 grid steps whenever B permits so v7x's two TensorCores both
    # get work (they share the 3.2 TB/s HBM pipe).
    if B >= 2 * align:
        half = pl.cdiv(pl.cdiv(B, 2), align) * align
        rows = min(rows, half)
    b_full = pl.cdiv(B, align) * align
    return int(min(rows, b_full))


def l2norm(x: jax.Array, *, block_b: int | None = None) -> jax.Array:
    """L2-normalize each row of a (B, D) array, matching torch L2Norm."""
    B, D = x.shape
    itemsize = jnp.dtype(x.dtype).itemsize
    target_per_buf, vmem_cap = _vmem_budget()
    # Sublane packing: 8 rows for 4-byte, 16 for 2-byte, 32 for 1-byte dtypes.
    align = max(8, 32 // max(1, itemsize))

    if block_b is None:
        block_b = _choose_block_b(B, D, itemsize, target_per_buf, align)

    # VMEM accounting: double-buffered input + output (4 buffers) plus a
    # worst-case f32 intermediate of one block, plus headroom.
    def _needed(bb: int) -> int:
        return 4 * bb * D * itemsize + bb * D * 4 + (4 << 20)

    usable = max(16 << 20, vmem_cap - (8 << 20))
    while _needed(block_b) > usable and block_b > align:
        block_b = max(align, ((block_b // 2) // align) * align)
    # TODO(synk): for extreme D where even an `align`-row block exceeds VMEM,
    # split D onto a second grid axis with an f32 partial-sum scratch.

    vmem_limit = int(min(usable, max(32 << 20, _needed(block_b))))
    grid = pl.cdiv(B, block_b)

    return pl.pallas_call(
        _l2norm_kernel,
        out_shape=jax.ShapeDtypeStruct((B, D), x.dtype),
        grid=(grid,),
        in_specs=[pl.BlockSpec((block_b, D), lambda i: (i, 0))],
        out_specs=pl.BlockSpec((block_b, D), lambda i: (i, 0)),
        compiler_params=pltpu.CompilerParams(
            dimension_semantics=("parallel",),
            vmem_limit_bytes=vmem_limit,
        ),
    )(x)


def _ref(x):
    xf = x.astype(jnp.float32)
    norm = jnp.sqrt(jnp.sum(xf * xf, axis=1, keepdims=True) + EPS)
    return (xf / norm).astype(x.dtype)


if __name__ == "__main__":
    key = jax.random.PRNGKey(0)
    k1, k2, k3, k4 = jax.random.split(key, 4)

    # HardNet descriptors: batch of 128-dim feature vectors.
    B, D = 8, 128
    x = jax.random.normal(k1, (B, D), dtype=jnp.float32)
    out = jax.block_until_ready(l2norm(x))
    assert out.shape == x.shape and out.dtype == x.dtype
    assert jnp.allclose(out, _ref(x), atol=1e-5, rtol=1e-5)

    # Ragged batch + non-128-multiple D (exercises masked edge block; no
    # wrapper pad/trim any more).
    B2, D2 = 13, 96
    x2 = jax.random.normal(k2, (B2, D2), dtype=jnp.float32)
    out2 = jax.block_until_ready(l2norm(x2))
    assert out2.shape == x2.shape and out2.dtype == x2.dtype
    assert jnp.allclose(out2, _ref(x2), atol=1e-5, rtol=1e-5)

    # Multi-step grid (>= 2 steps) with a ragged last block.
    B3, D3 = 300, 128
    x3 = jax.random.normal(k3, (B3, D3), dtype=jnp.float32)
    out3 = jax.block_until_ready(l2norm(x3))
    assert out3.shape == x3.shape
    assert jnp.allclose(out3, _ref(x3), atol=1e-5, rtol=1e-5)

    # bf16 path: scale multiply done in f32, single cast at the end.
    B4, D4 = 32, 128
    x4 = jax.random.normal(k4, (B4, D4), dtype=jnp.bfloat16)
    out4 = jax.block_until_ready(l2norm(x4))
    assert out4.shape == x4.shape and out4.dtype == x4.dtype
    assert jnp.allclose(out4.astype(jnp.float32), _ref(x4).astype(jnp.float32),
                        atol=1e-2, rtol=1e-2)

    print("KERNEL_OK")
</pallas_src>

<mosaic_0001>
module attributes {stable_mosaic.version = 11 : i64} {
  func.func @_l2norm_kernel(%arg0: i32, %arg1: memref<8x128xf32, #tpu.memory_space<vmem>>, %arg2: memref<8x128xf32, #tpu.memory_space<vmem>>) attributes {dimension_semantics = [#tpu.dimension_semantics<parallel>], iteration_bounds = array<i64: 1>, scalar_prefetch = 0 : i64, scratch_operands = 0 : i64, tpu.core_type = #tpu.core_type<tc>, window_params = [{transform_indices = @transform_0, window_bounds = array<i64: 8, 128>}, {transform_indices = @transform_1, window_bounds = array<i64: 8, 128>}]} {
    %c0 = arith.constant 0 : index
    %c0_0 = arith.constant 0 : index
    %0 = vector.load %arg1[%c0, %c0_0] : memref<8x128xf32, #tpu.memory_space<vmem>>, vector<8x128xf32>
    %1 = arith.mulf %0, %0 : vector<8x128xf32>
    %cst = arith.constant dense<0.000000e+00> : vector<8xf32>
    %2 = vector.multi_reduction <add>, %1, %cst [1] : vector<8x128xf32> to vector<8xf32>
    %3 = vector.shape_cast %2 : vector<8xf32> to vector<8x1xf32>
    %cst_1 = arith.constant 1.000000e-10 : f32
    %4 = vector.broadcast %cst_1 : f32 to vector<8x1xf32>
    %5 = arith.addf %3, %4 : vector<8x1xf32>
    %6 = math.rsqrt %5 : vector<8x1xf32>
    %7 = vector.broadcast %6 : vector<8x1xf32> to vector<8x128xf32>
    %8 = arith.mulf %0, %7 : vector<8x128xf32>
    %c0_2 = arith.constant 0 : index
    %c0_3 = arith.constant 0 : index
    %9 = vector.load %arg2[%c0_2, %c0_3] : memref<8x128xf32, #tpu.memory_space<vmem>>, vector<8x128xf32>
    tpu.vector_store %arg2[%c0_2, %c0_3], %8 {strides = array<i32>} : memref<8x128xf32, #tpu.memory_space<vmem>>, vector<8x128xf32>,
    return
  }
  func.func @transform_0(%arg0: i32) -> (i32, i32) {
    %c0_i32 = arith.constant 0 : i32
    %c0_i32_0 = arith.constant 0 : i32
    return %arg0, %c0_i32 : i32, i32
  }
  func.func @transform_1(%arg0: i32) -> (i32, i32) {
    %c0_i32 = arith.constant 0 : i32
    %c0_i32_0 = arith.constant 0 : i32
    return %arg0, %c0_i32 : i32, i32
  }
}

</mosaic_0001>

<bundles_post_ra>
// kernel: tpu_custom_call.1
= control target key start
LH: loop header
LB: loop body
LE: loop exit
PB: predicated region body
PF: predicated region fallthrough
CT: control target
= control target key end

     0   :  { %6 = vsyncpa [#allocation3], 0  ;;  %s131_s0 = inlined_call_operand.hbm [shape: f32[8,128], index: 0, kind: input, shape index: {}]   ;;  %s132_s1 = inlined_call_operand.hbm [shape: f32[8,128], index: 1, kind: output, shape index: {}]  }
   0x1   :  { %7 = vsyncpa [#allocation4], 0  ;;  %s13_s8 = sshll.u32 %s131_s0, 4  ;;  %s113_s9 = smov [#allocation2]   ;;  %s14_s8 = int_to_ptr.hbm [resolvable:$true] %s13_s8 }
   0x2   :  { %s15_s10 = sshll.u32 %s113_s9, 4  ;;  %s16_s10 = int_to_ptr.vmem [resolvable:$true] %s15_s10 }
   0x3   :  { %18 = dma.hbm_to_vmem [thread:$0]  %s14_s8, 128, %s16_s10, [#allocation3]  }
   0x4   :  { %109 = dma.done.wait [#allocation3], 128  }
   0x5   :  { %110 = vsyncadd [#allocation3], 4294967168  ;;  %v23_v0 = vld [vmem:[#allocation2] sm:$0xff]  ;;  %s114_s0 = smov [#allocation5]   ;;  %s47_s14 = sshll.u32 %s132_s1, 4  ;;  %s48_s14 = int_to_ptr.hbm [resolvable:$true] %s47_s14 }
   0x6   :  { %v24_v1 = vmul.f32 %v23_v0, %v23_v0  ;;  %s45_s11 = sshll.u32 %s114_s0, 4  ;;  %s46_s11 = int_to_ptr.vmem [resolvable:$true] %s45_s11 }
   0x8   :  { %25 = vadd.xlane.f32.xlu0 %v24_v1 }
  0x7b   :  { %v26_v2 = vpop.xlane.xlu0 %25 }
  0x7c   :  { %v27_v3 = vadd.f32 1e-10, %v26_v2 }
  0x7e   :  { %59 = vrsqrt.f32 %v27_v3  ;;  %vm34_vm1 = vweird.f32 %v27_v3 }
  0x84   :  { %v60_v4 = vpop.eup %59 }
  0x85   :  { %v29_v5 = vmul.f32 %v60_v4, %v27_v3  ;;  %vm35_vm0 = vweird.f32 %v60_v4 }
  0x86   :  { %vm36_vm2 = vmor %vm34_vm1, %vm35_vm0 }
  0x87   :  { %v30_v6 = vmul.f32 %v60_v4, %v29_v5 }
  0x89   :  { %v31_v7 = vmul.f32 0.5, %v30_v6 }
  0x8b   :  { %v32_v8 = vsub.f32 1.5, %v31_v7 }
  0x8d   :  { %v33_v9 = vmul.f32 %v60_v4, %v32_v8 }
  0x8f   :  { %v37_v10 = vsel %vm36_vm2, %v60_v4, %v33_v9 }
  0x90   :  { %v38_v11 = vmul.f32 %v37_v10, %v23_v0 }
  0x92   :  { %39 = vst [vmem:[#allocation5] sm:$0xff] %v38_v11 }
  0x93   :  { %50 = dma.vmem_to_hbm [thread:$0]  %s46_s11, 128, %s48_s14, [#allocation4]  }
  0x94   :  { %111 = dma.done.wait [#allocation4], 128  }
  0x95   :  { %112 = vsyncadd [#allocation4], 4294967168 }
  0x96   :  { %55 = vsyncpa [#allocation3], 1 }
  0x97   :  { %56 = vsyncpa [#allocation4], 1 }

</bundles_post_ra>
